<compile_context>
chip_gen: v6e
topology: v6e:2x2x1
jax: 0.10.0
libtpu: 0.0.40
codegen_flags: <defaults>
</compile_context>

<pallas_src>
import functools
import math

import numpy as np

import jax
import jax.numpy as jnp
from jax.experimental import pallas as pl
from jax.experimental.pallas import tpu as pltpu

_LANE = 128
_SUBLANE = 8
_EPS = 1e-5


def _round_up(x, m):
    return ((x + m - 1) // m) * m


def _apply_activation(y, activation):
    if activation == "ReLU":
        return jnp.maximum(y, 0.0)
    if activation == "Tanh":
        return jnp.tanh(y)
    if activation == "Sigmoid":
        return jax.nn.sigmoid(y)
    if activation == "LeakyReLU":
        return jnp.where(y >= 0.0, y, 0.01 * y)
    return y  # 'Linear' -> identity


def _fused_decoder_kernel(x_ref, w_ref, gb_ref, o_ref, *, activations, fin0,
                          eps):
    """Whole decoder in one kernel body with 3 packed VMEM operands.

    x_ref : (B, fin0)     f32   latent input (fin0 = latent_dim rounded to 8)
    w_ref : (L, F, F)     bf16  zero-padded weight slab, layer i at [i]
    gb_ref: (L, 2, F)     f32   row 0 = gamma, row 1 = beta (padded: 1 / 0)
    o_ref : (B, fout_last)f32   decoder output (unpadded feature count)

    Per layer: h = h @ W (bf16 MXU, f32 acc, bias omitted — cancelled by the
    training-mode BN mean subtraction); BN with var = E[h^2] - mean^2 and the
    mean folded into the shift; activation.
    """
    h = x_ref[...]                                            # (B, fin0) f32
    n_out = o_ref.shape[1]
    n_layers = len(activations)

    for i, act in enumerate(activations):
        w = w_ref[i]                                          # (F, F) bf16
        if i == 0:
            w = w[:fin0, :]                                   # static slice
        # Linear (bias-free), bf16 inputs -> single MXU pass, f32 accumulate.
        h = jnp.dot(h.astype(jnp.bfloat16), w,
                    preferred_element_type=jnp.float32)       # (B, F) f32

        # BatchNorm1d (training mode, eps=1e-5): two independent reductions,
        # single FMA-style normalize pass.
        mean = jnp.mean(h, axis=0, keepdims=True)             # (1, F)
        ex2 = jnp.mean(h * h, axis=0, keepdims=True)          # (1, F)
        var = jnp.maximum(ex2 - mean * mean, 0.0)             # clamp f32 cancel
        gb = gb_ref[i]                                        # (2, F) f32
        scale = gb[0:1, :] * jax.lax.rsqrt(var + eps)         # gamma folded
        shift = gb[1:2, :] - mean * scale                     # beta - mean*scale
        h = h * scale + shift                                 # one (B,F) pass
        h = _apply_activation(h, act)

        del n_layers  # (loop is fully unrolled at trace time)
        n_layers = len(activations)

    # Exact-width store: (B, fout_last) masked vst — cheaper than a padded
    # HBM store plus a separate post-kernel slice dispatch.
    o_ref[...] = h[:, :n_out].astype(o_ref.dtype)


def fused_decoder_forward(x, w_slab, gb_slab, *, activations, fin0, fout_last,
                          eps=_EPS):
    """Run the whole decoder as a single pallas_call (3 inputs, 1 output)."""
    B = x.shape[0]
    if x.shape[1] < fin0:  # only if latent_dim is not a multiple of 8
        x = jnp.pad(x, ((0, 0), (0, fin0 - x.shape[1])))
    kernel = functools.partial(_fused_decoder_kernel,
                               activations=tuple(activations),
                               fin0=fin0, eps=eps)
    vmem = pl.BlockSpec(memory_space=pltpu.MemorySpace.VMEM)
    return pl.pallas_call(
        kernel,
        out_shape=jax.ShapeDtypeStruct((B, fout_last), jnp.float32),
        in_specs=[vmem, vmem, vmem],
        out_specs=vmem,
    )(x, w_slab, gb_slab)


class PallasDecoder:
    """JAX/Pallas port of BETA_ANNEALED_VAE dense_vae.decoder (forward only)."""

    def __init__(self, decoder_neurons, decoder_activation, latent_dim,
                 key=jax.random.PRNGKey(0)):
        assert len(decoder_neurons) == len(decoder_activation)
        self.activations = tuple(decoder_activation)
        self.latent_dim = latent_dim

        dims = [latent_dim] + list(decoder_neurons)
        self.params = []
        for i in range(len(decoder_neurons)):
            fin, fout = dims[i], dims[i + 1]
            key, kw, kb = jax.random.split(key, 3)
            bound = 1.0 / math.sqrt(fin)
            # PyTorch nn.Linear default init: U(-1/sqrt(fin), 1/sqrt(fin)),
            # stored already transposed as (fin, fout).
            w = jax.random.uniform(kw, (fin, fout), jnp.float32, -bound, bound)
            # Bias kept for the reference model; it is dead weight for the
            # kernel (cancelled by training-mode BN mean subtraction).
            b = jax.random.uniform(kb, (fout,), jnp.float32, -bound, bound)
            gamma = jnp.ones((fout,), jnp.float32)   # BatchNorm1d defaults
            beta = jnp.zeros((fout,), jnp.float32)
            self.params.append((w, b, gamma, beta))

        # ---- pack kernel operands (done once, host side) -------------------
        L = len(self.params)
        self._fout_last = dims[-1]
        F = max(_LANE, _round_up(max(dims), _LANE))
        self._fin0 = _round_up(latent_dim, _SUBLANE)

        w_slab = np.zeros((L, F, F), np.float32)
        gb_slab = np.zeros((L, 2, F), np.float32)
        gb_slab[:, 0, :] = 1.0  # gamma pad value (irrelevant: h==0 there)
        for i, (w, _b, gamma, beta) in enumerate(self.params):
            fin, fout = w.shape
            w_slab[i, :fin, :fout] = np.asarray(w)
            gb_slab[i, 0, :fout] = np.asarray(gamma)
            gb_slab[i, 1, :fout] = np.asarray(beta)
        # bf16 MXU inputs: halve weight DMA bytes, single-pass vmatmul.
        self._w_slab = jnp.asarray(w_slab).astype(jnp.bfloat16)
        self._gb_slab = jnp.asarray(gb_slab)

        self._forward = jax.jit(functools.partial(
            fused_decoder_forward,
            activations=self.activations,
            fin0=self._fin0,
            fout_last=self._fout_last,
            eps=_EPS))

    def __call__(self, x):
        assert x.shape[1] == self.latent_dim
        x_rec = self._forward(x, self._w_slab, self._gb_slab)
        return {"x_rec": x_rec}


def _reference_forward(params, activations, x, eps=_EPS,
                       matmul_dtype=jnp.float32):
    """Pure-JAX reference (PyTorch forward semantics, incl. Linear bias).

    matmul_dtype=bf16 gives a precision-matched check of the kernel's
    algebraic rewrites (bias drop, var = E[h^2]-mean^2, folded shift);
    matmul_dtype=f32 is the original module's full-precision math.
    """
    h_in = x
    for (w, b, gamma, beta), act in zip(params, activations):
        if matmul_dtype == jnp.float32:
            h = h_in @ w + b
        else:
            h = jnp.dot(h_in.astype(matmul_dtype), w.astype(matmul_dtype),
                        preferred_element_type=jnp.float32) + b
        mean = jnp.mean(h, axis=0, keepdims=True)
        var = jnp.mean((h - mean) ** 2, axis=0, keepdims=True)
        y = (h - mean) / jnp.sqrt(var + eps) * gamma + beta
        h_in = _apply_activation(y, act)
    return h_in


if __name__ == "__main__":
    latent_dim = 8
    decoder_neurons = [32, 64, 16]
    decoder_activation = ["ReLU", "ReLU", "Linear"]
    batch = 8

    root = jax.random.PRNGKey(0)
    k_params, k_z = jax.random.split(root)

    dec = PallasDecoder(decoder_neurons, decoder_activation, latent_dim,
                        key=k_params)
    z = jax.random.normal(k_z, (batch, latent_dim), dtype=jnp.float32)

    out = dec(z)
    x_rec = jax.block_until_ready(out["x_rec"])
    assert x_rec.shape == (batch, decoder_neurons[-1])

    # Precision-matched reference (bf16 matmul inputs, standard BN math):
    # validates all in-kernel algebraic rewrites tightly.
    ref_matched = jax.block_until_ready(
        _reference_forward(dec.params, dec.activations, z,
                           matmul_dtype=jnp.bfloat16))
    assert jnp.allclose(x_rec, ref_matched, atol=1e-2, rtol=1e-2), \
        "mismatch vs precision-matched reference"

    # Full-f32 reference (original module semantics): bounds bf16 MXU drift.
    ref_f32 = jax.block_until_ready(
        _reference_forward(dec.params, dec.activations, z,
                           matmul_dtype=jnp.float32))
    assert jnp.allclose(x_rec, ref_f32, atol=1e-1, rtol=1e-1), \
        "mismatch vs f32 reference"

    print("KERNEL_OK")
</pallas_src>

<mosaic_0001>
module attributes {stable_mosaic.version = 11 : i64} {
  func.func @_fused_decoder_kernel(%arg0: memref<8x8xf32, #tpu.memory_space<vmem>>, %arg1: memref<3x128x128xbf16, #tpu.memory_space<vmem>>, %arg2: memref<3x2x128xf32, #tpu.memory_space<vmem>>, %arg3: memref<8x16xf32, #tpu.memory_space<vmem>>) attributes {dimension_semantics = [], scalar_prefetch = 0 : i64, scratch_operands = 0 : i64, tpu.core_type = #tpu.core_type<tc>} {
    %c0 = arith.constant 0 : index
    %c0_0 = arith.constant 0 : index
    %0 = vector.load %arg0[%c0, %c0_0] : memref<8x8xf32, #tpu.memory_space<vmem>>, vector<8x8xf32>
    %c0_1 = arith.constant 0 : index
    %c0_2 = arith.constant 0 : index
    %c0_3 = arith.constant 0 : index
    %1 = vector.load %arg1[%c0_1, %c0_2, %c0_3] : memref<3x128x128xbf16, #tpu.memory_space<vmem>>, vector<1x128x128xbf16>
    %2 = vector.shape_cast %1 : vector<1x128x128xbf16> to vector<128x128xbf16>
    %3 = vector.extract_strided_slice %2 {offsets = [0, 0], sizes = [8, 128], strides = [1, 1]} : vector<128x128xbf16> to vector<8x128xbf16>
    %4 = arith.truncf %0 : vector<8x8xf32> to vector<8x8xbf16>
    %cst = arith.constant dense<0.000000e+00> : vector<8x128xf32>
    %5 = tpu.matmul %4, %3, %cst {dimension_numbers = #tpu.dot_dimension_numbers<[1], [0], [0], [1], [0, 0, 1, 1], [], []>} : vector<8x8xbf16>, vector<8x128xbf16>, vector<8x128xf32> -> vector<8x128xf32>
    %cst_4 = arith.constant dense<0.000000e+00> : vector<128xf32>
    %6 = vector.multi_reduction <add>, %5, %cst_4 [0] : vector<8x128xf32> to vector<128xf32>
    %7 = vector.shape_cast %6 : vector<128xf32> to vector<1x128xf32>
    %cst_5 = arith.constant 8.000000e+00 : f32
    %8 = vector.broadcast %cst_5 : f32 to vector<1x128xf32>
    %9 = arith.divf %7, %8 : vector<1x128xf32>
    %10 = arith.mulf %5, %5 : vector<8x128xf32>
    %cst_6 = arith.constant dense<0.000000e+00> : vector<128xf32>
    %11 = vector.multi_reduction <add>, %10, %cst_6 [0] : vector<8x128xf32> to vector<128xf32>
    %12 = vector.shape_cast %11 : vector<128xf32> to vector<1x128xf32>
    %cst_7 = arith.constant 8.000000e+00 : f32
    %13 = vector.broadcast %cst_7 : f32 to vector<1x128xf32>
    %14 = arith.divf %12, %13 : vector<1x128xf32>
    %15 = arith.mulf %9, %9 : vector<1x128xf32>
    %16 = arith.subf %14, %15 : vector<1x128xf32>
    %cst_8 = arith.constant 0.000000e+00 : f32
    %17 = vector.broadcast %cst_8 : f32 to vector<1x128xf32>
    %18 = arith.maximumf %16, %17 : vector<1x128xf32>
    %c0_9 = arith.constant 0 : index
    %c0_10 = arith.constant 0 : index
    %c0_11 = arith.constant 0 : index
    %19 = vector.load %arg2[%c0_9, %c0_10, %c0_11] : memref<3x2x128xf32, #tpu.memory_space<vmem>>, vector<1x2x128xf32>
    %20 = vector.shape_cast %19 : vector<1x2x128xf32> to vector<2x128xf32>
    %21 = vector.extract_strided_slice %20 {offsets = [0, 0], sizes = [1, 128], strides = [1, 1]} : vector<2x128xf32> to vector<1x128xf32>
    %cst_12 = arith.constant 9.99999974E-6 : f32
    %22 = vector.broadcast %cst_12 : f32 to vector<1x128xf32>
    %23 = arith.addf %18, %22 : vector<1x128xf32>
    %24 = math.rsqrt %23 : vector<1x128xf32>
    %25 = arith.mulf %21, %24 : vector<1x128xf32>
    %26 = vector.extract_strided_slice %20 {offsets = [1, 0], sizes = [1, 128], strides = [1, 1]} : vector<2x128xf32> to vector<1x128xf32>
    %27 = arith.mulf %9, %25 : vector<1x128xf32>
    %28 = arith.subf %26, %27 : vector<1x128xf32>
    %29 = vector.broadcast %25 : vector<1x128xf32> to vector<8x128xf32>
    %30 = arith.mulf %5, %29 : vector<8x128xf32>
    %31 = vector.broadcast %28 : vector<1x128xf32> to vector<8x128xf32>
    %32 = arith.addf %30, %31 : vector<8x128xf32>
    %cst_13 = arith.constant 0.000000e+00 : f32
    %33 = vector.broadcast %cst_13 : f32 to vector<8x128xf32>
    %34 = arith.maximumf %32, %33 : vector<8x128xf32>
    %c1 = arith.constant 1 : index
    %c0_14 = arith.constant 0 : index
    %c0_15 = arith.constant 0 : index
    %35 = vector.load %arg1[%c1, %c0_14, %c0_15] : memref<3x128x128xbf16, #tpu.memory_space<vmem>>, vector<1x128x128xbf16>
    %36 = vector.shape_cast %35 : vector<1x128x128xbf16> to vector<128x128xbf16>
    %37 = arith.truncf %34 : vector<8x128xf32> to vector<8x128xbf16>
    %cst_16 = arith.constant dense<0.000000e+00> : vector<8x128xf32>
    %38 = tpu.matmul %37, %36, %cst_16 {dimension_numbers = #tpu.dot_dimension_numbers<[1], [0], [0], [1], [0, 0, 1, 1], [], []>} : vector<8x128xbf16>, vector<128x128xbf16>, vector<8x128xf32> -> vector<8x128xf32>
    %cst_17 = arith.constant dense<0.000000e+00> : vector<128xf32>
    %39 = vector.multi_reduction <add>, %38, %cst_17 [0] : vector<8x128xf32> to vector<128xf32>
    %40 = vector.shape_cast %39 : vector<128xf32> to vector<1x128xf32>
    %cst_18 = arith.constant 8.000000e+00 : f32
    %41 = vector.broadcast %cst_18 : f32 to vector<1x128xf32>
    %42 = arith.divf %40, %41 : vector<1x128xf32>
    %43 = arith.mulf %38, %38 : vector<8x128xf32>
    %cst_19 = arith.constant dense<0.000000e+00> : vector<128xf32>
    %44 = vector.multi_reduction <add>, %43, %cst_19 [0] : vector<8x128xf32> to vector<128xf32>
    %45 = vector.shape_cast %44 : vector<128xf32> to vector<1x128xf32>
    %cst_20 = arith.constant 8.000000e+00 : f32
    %46 = vector.broadcast %cst_20 : f32 to vector<1x128xf32>
    %47 = arith.divf %45, %46 : vector<1x128xf32>
    %48 = arith.mulf %42, %42 : vector<1x128xf32>
    %49 = arith.subf %47, %48 : vector<1x128xf32>
    %cst_21 = arith.constant 0.000000e+00 : f32
    %50 = vector.broadcast %cst_21 : f32 to vector<1x128xf32>
    %51 = arith.maximumf %49, %50 : vector<1x128xf32>
    %c1_22 = arith.constant 1 : index
    %c0_23 = arith.constant 0 : index
    %c0_24 = arith.constant 0 : index
    %52 = vector.load %arg2[%c1_22, %c0_23, %c0_24] : memref<3x2x128xf32, #tpu.memory_space<vmem>>, vector<1x2x128xf32>
    %53 = vector.shape_cast %52 : vector<1x2x128xf32> to vector<2x128xf32>
    %54 = vector.extract_strided_slice %53 {offsets = [0, 0], sizes = [1, 128], strides = [1, 1]} : vector<2x128xf32> to vector<1x128xf32>
    %cst_25 = arith.constant 9.99999974E-6 : f32
    %55 = vector.broadcast %cst_25 : f32 to vector<1x128xf32>
    %56 = arith.addf %51, %55 : vector<1x128xf32>
    %57 = math.rsqrt %56 : vector<1x128xf32>
    %58 = arith.mulf %54, %57 : vector<1x128xf32>
    %59 = vector.extract_strided_slice %53 {offsets = [1, 0], sizes = [1, 128], strides = [1, 1]} : vector<2x128xf32> to vector<1x128xf32>
    %60 = arith.mulf %42, %58 : vector<1x128xf32>
    %61 = arith.subf %59, %60 : vector<1x128xf32>
    %62 = vector.broadcast %58 : vector<1x128xf32> to vector<8x128xf32>
    %63 = arith.mulf %38, %62 : vector<8x128xf32>
    %64 = vector.broadcast %61 : vector<1x128xf32> to vector<8x128xf32>
    %65 = arith.addf %63, %64 : vector<8x128xf32>
    %cst_26 = arith.constant 0.000000e+00 : f32
    %66 = vector.broadcast %cst_26 : f32 to vector<8x128xf32>
    %67 = arith.maximumf %65, %66 : vector<8x128xf32>
    %c2 = arith.constant 2 : index
    %c0_27 = arith.constant 0 : index
    %c0_28 = arith.constant 0 : index
    %68 = vector.load %arg1[%c2, %c0_27, %c0_28] : memref<3x128x128xbf16, #tpu.memory_space<vmem>>, vector<1x128x128xbf16>
    %69 = vector.shape_cast %68 : vector<1x128x128xbf16> to vector<128x128xbf16>
    %70 = arith.truncf %67 : vector<8x128xf32> to vector<8x128xbf16>
    %cst_29 = arith.constant dense<0.000000e+00> : vector<8x128xf32>
    %71 = tpu.matmul %70, %69, %cst_29 {dimension_numbers = #tpu.dot_dimension_numbers<[1], [0], [0], [1], [0, 0, 1, 1], [], []>} : vector<8x128xbf16>, vector<128x128xbf16>, vector<8x128xf32> -> vector<8x128xf32>
    %cst_30 = arith.constant dense<0.000000e+00> : vector<128xf32>
    %72 = vector.multi_reduction <add>, %71, %cst_30 [0] : vector<8x128xf32> to vector<128xf32>
    %73 = vector.shape_cast %72 : vector<128xf32> to vector<1x128xf32>
    %cst_31 = arith.constant 8.000000e+00 : f32
    %74 = vector.broadcast %cst_31 : f32 to vector<1x128xf32>
    %75 = arith.divf %73, %74 : vector<1x128xf32>
    %76 = arith.mulf %71, %71 : vector<8x128xf32>
    %cst_32 = arith.constant dense<0.000000e+00> : vector<128xf32>
    %77 = vector.multi_reduction <add>, %76, %cst_32 [0] : vector<8x128xf32> to vector<128xf32>
    %78 = vector.shape_cast %77 : vector<128xf32> to vector<1x128xf32>
    %cst_33 = arith.constant 8.000000e+00 : f32
    %79 = vector.broadcast %cst_33 : f32 to vector<1x128xf32>
    %80 = arith.divf %78, %79 : vector<1x128xf32>
    %81 = arith.mulf %75, %75 : vector<1x128xf32>
    %82 = arith.subf %80, %81 : vector<1x128xf32>
    %cst_34 = arith.constant 0.000000e+00 : f32
    %83 = vector.broadcast %cst_34 : f32 to vector<1x128xf32>
    %84 = arith.maximumf %82, %83 : vector<1x128xf32>
    %c2_35 = arith.constant 2 : index
    %c0_36 = arith.constant 0 : index
    %c0_37 = arith.constant 0 : index
    %85 = vector.load %arg2[%c2_35, %c0_36, %c0_37] : memref<3x2x128xf32, #tpu.memory_space<vmem>>, vector<1x2x128xf32>
    %86 = vector.shape_cast %85 : vector<1x2x128xf32> to vector<2x128xf32>
    %87 = vector.extract_strided_slice %86 {offsets = [0, 0], sizes = [1, 128], strides = [1, 1]} : vector<2x128xf32> to vector<1x128xf32>
    %cst_38 = arith.constant 9.99999974E-6 : f32
    %88 = vector.broadcast %cst_38 : f32 to vector<1x128xf32>
    %89 = arith.addf %84, %88 : vector<1x128xf32>
    %90 = math.rsqrt %89 : vector<1x128xf32>
    %91 = arith.mulf %87, %90 : vector<1x128xf32>
    %92 = vector.extract_strided_slice %86 {offsets = [1, 0], sizes = [1, 128], strides = [1, 1]} : vector<2x128xf32> to vector<1x128xf32>
    %93 = arith.mulf %75, %91 : vector<1x128xf32>
    %94 = arith.subf %92, %93 : vector<1x128xf32>
    %95 = vector.broadcast %91 : vector<1x128xf32> to vector<8x128xf32>
    %96 = arith.mulf %71, %95 : vector<8x128xf32>
    %97 = vector.broadcast %94 : vector<1x128xf32> to vector<8x128xf32>
    %98 = arith.addf %96, %97 : vector<8x128xf32>
    %99 = vector.extract_strided_slice %98 {offsets = [0, 0], sizes = [8, 16], strides = [1, 1]} : vector<8x128xf32> to vector<8x16xf32>
    %c0_39 = arith.constant 0 : index
    %c0_40 = arith.constant 0 : index
    %100 = vector.load %arg3[%c0_39, %c0_40] : memref<8x16xf32, #tpu.memory_space<vmem>>, vector<8x16xf32>
    tpu.vector_store %arg3[%c0_39, %c0_40], %99 {strides = array<i32>} : memref<8x16xf32, #tpu.memory_space<vmem>>, vector<8x16xf32>,
    return
  }
}

</mosaic_0001>

<bundles_post_ra>
// kernel: fused_decoder_forward.1
= control target key start
LH: loop header
LB: loop body
LE: loop exit
PB: predicated region body
PF: predicated region fallthrough
CT: control target
= control target key end

     0   :  { %8 = vsyncpa [#allocation3], 0  ;;  %s725_s0 = inlined_call_operand.hbm [shape: f32[8,8], index: 0, kind: input, shape index: {}]   ;;  %s726_s1 = inlined_call_operand.hbm [shape: bf16[3,128,128], index: 1, kind: input, shape index: {}]   ;;  %s727_s2 = inlined_call_operand.hbm [shape: f32[3,2,128], index: 2, kind: input, shape index: {}]   ;;  %s728_s3 = inlined_call_operand.hbm [shape: f32[8,16], index: 3, kind: output, shape index: {}]  }
   0x1   :  { %9 = vsyncpa [#allocation6], 0 }
   0x2   :  { %10 = vsyncpa [#allocation4], 0  ;;  %s653_s12 = smov [#allocation5]  }
   0x3   :  { %s26_s13 = sshll.u32 %s653_s12, 4  ;;  %s27_s13 = int_to_ptr.vmem [resolvable:$true] %s26_s13 }
   0x4   :  { %s575_s14 = scalar_lea.vmem %s27_s13, 3072  ;;  %p580_p1 = scmp.lt.s32.totalorder %s27_s13, %s27_s13 }
   0x5   :  { %p576_p0 = scmp.ne.s32.totalorder %s27_s13, %s575_s14  ;;  %p581_p2 = scmp.lt.s32.totalorder %s575_s14, %s575_s14 }
   0x7   :  { %p582_p3 = por %p581_p2, %p580_p1 }
   0x9   :  { %p583_p4 = pnand %p582_p3, %p576_p0 }
   0xb   :  { %586 = shalt.err (!%p583_p4)
}
   0xc   :  { %s654_s15 = smov 64   ;;  %s655_s16 = smov 4  }
   0xd   :  { %32 = dma.hbm_to_vmem [thread:$0]  %s726_s1, 3072, %s27_s13, [#allocation6], %s654_s15, %s654_s15, %s655_s16  }
   0xe   :  { %s656_s19 = smov [#allocation2]   ;;  %s657_s21 = smov [#allocation7]  }
   0xf   :  { %s17_s20 = sshll.u32 %s656_s19, 4  ;;  %s38_s22 = sshll.u32 %s657_s21, 4  ;;  %s18_s20 = int_to_ptr.vmem [resolvable:$true] %s17_s20  ;;  %s39_s22 = int_to_ptr.vmem [resolvable:$true] %s38_s22 }
  0x10   :  { %s595_s23 = scalar_lea.vmem %s18_s20, 128  ;;  %p600_p6 = scmp.lt.s32.totalorder %s18_s20, %s18_s20 }
  0x11   :  { %p596_p5 = scmp.ne.s32.totalorder %s18_s20, %s595_s23  ;;  %p601_p7 = scmp.lt.s32.totalorder %s595_s23, %s595_s23 }
  0x13   :  { %p602_p8 = por %p601_p7, %p600_p6 }
  0x15   :  { %p603_p9 = pnand %p602_p8, %p596_p5 }
  0x17   :  { %606 = shalt.err (!%p603_p9)
}
  0x18   :  { %20 = dma.hbm_to_vmem [thread:$0]  %s725_s0, 128, %s18_s20, [#allocation3]  }
  0x19   :  { %s615_s26 = scalar_lea.vmem %s39_s22, 96  ;;  %p620_p11 = scmp.lt.s32.totalorder %s39_s22, %s39_s22 }
  0x1a   :  { %p616_p10 = scmp.ne.s32.totalorder %s39_s22, %s615_s26  ;;  %p621_p12 = scmp.lt.s32.totalorder %s615_s26, %s615_s26 }
  0x1c   :  { %p622_p13 = por %p621_p12, %p620_p11 }
  0x1e   :  { %p623_p0 = pnand %p622_p13, %p616_p10 }
  0x20   :  { %626 = shalt.err (!%p623_p0)
}
  0x21   :  { %s658_s1 = smov 32   ;;  %s659_s27 = smov 2  }
  0x22   :  { %44 = dma.hbm_to_vmem [thread:$0]  %s727_s2, 96, %s39_s22, [#allocation6], %s658_s1, %s658_s1, %s659_s27  }
  0x23   :  { %647 = dma.done.wait [#allocation3], 128  }
  0x24   :  { %648 = vsyncadd [#allocation3], 4294967168 }
  0x25   :  { %649 = dma.done.wait [#allocation6], 3168  }
  0x26   :  { %650 = vsyncadd [#allocation6], 4294964128  ;;  %v660_v0 = vmov 0.0   ;;  %vm661_vm0 = vmmov 0   ;;  %vm62_vm1 = vcmask 1043456   ;;  %v55_v2 = vld [vmem:[#allocation2] sm:$0xff]  ;;  %v134_v36 = vlaneseq }
  0x27   :  { %489 = vmatprep.subr.bf16.mxu0 %v660_v0  ;;  %491 = vmatprep.mubr.msk.bf16.mxu0 %vm661_vm0, %v660_v0  ;;  %v56_v1 = vld [vmem:[#allocation5] sm:$0xf]  ;;  %v57_v4 = vpack.c.bf16 %v55_v2, %v55_v2  ;;  %vm58_vm2 = vcmask 64512   ;;  %v545_v5 = vld [vmem:[#allocation5 + $0x78] sm:$0xff]   ;;  %v546_v6 = vld [vmem:[#allocation5 + $0x70] sm:$0xff]   ;;  %s662_s0 = smov [#allocation8]  }
  0x28   :  { %495 = vmatprep.subr.bf16.mxu1 %v660_v0  ;;  %511 = vmatprep.mubr.msk.bf16.mxu1 %vm661_vm0, %v660_v0  ;;  %v64_v3 = vsel %vm62_vm1, %v56_v1, 0  ;;  %v547_v7 = vld [vmem:[#allocation5 + $0x68] sm:$0xff]   ;;  %v548_v8 = vld [vmem:[#allocation5 + $0x60] sm:$0xff]   ;;  %v549_v9 = vld [vmem:[#allocation5 + $0x58] sm:$0xff]   ;;  %v135_v37 = vshrl.u32 %v134_v36, 7  ;;  %s442_s2 = sshll.u32 %s662_s0, 4  ;;  %s443_s2 = int_to_ptr.vmem [resolvable:$true] %s442_s2 }
  0x29   :  { %490 = vmatpush3.bf16.msra.mxu0 %v64_v3  ;;  %496 = vmatpush3.bf16.msra.mxu1 %v545_v5  ;;  %v550_v10 = vld [vmem:[#allocation5 + $0x50] sm:$0xff]   ;;  %v551_v11 = vld [vmem:[#allocation5 + $0x48] sm:$0xff]   ;;  %v552_v12 = vld [vmem:[#allocation5 + $0x40] sm:$0xff]   ;;  %vm434_vm3 = vcmask 130048   ;;  %s627_s30 = scalar_lea.vmem %s443_s2, 128  ;;  %p632_p2 = scmp.lt.s32.totalorder %s443_s2, %s443_s2 }
  0x2a   :  { %515 = vmatprep.subr.bf16.mxu0 %v660_v0  ;;  %497 = vmatprep.subr.bf16.mxu1 %v660_v0  ;;  %v125_v38 = vld [vmem:[#allocation7] sm:$0x3]  ;;  %v705_v41 = vsub.s32 0, %v135_v37  ;;  %v708_v45 = vsub.s32 1, %v135_v37  ;;  %v553_v52 = vld [vmem:[#allocation5 + $0xb8] sm:$0xff]   ;;  %v554_v53 = vld [vmem:[#allocation5 + $0xb0] sm:$0xff]   ;;  %p628_p1 = scmp.ne.s32.totalorder %s443_s2, %s627_s30  ;;  %p633_p3 = scmp.lt.s32.totalorder %s627_s30, %s627_s30 }
  0x2b   :  { %v555_v54 = vld [vmem:[#allocation5 + $0xa8] sm:$0xff]   ;;  %v556_v55 = vld [vmem:[#allocation5 + $0xa0] sm:$0xff]   ;;  %v557_v56 = vld [vmem:[#allocation5 + $0x98] sm:$0xff]  }
  0x2c   :  { %492 = vmatmul.mubr.msk.bf16.vlgmr.msra.gmra.mxu0 %vm58_vm2, %v57_v4  ;;  %v558_v57 = vld [vmem:[#allocation5 + $0x90] sm:$0xff]   ;;  %v559_v58 = vld [vmem:[#allocation5 + $0x88] sm:$0xff]   ;;  %v560_v59 = vld [vmem:[#allocation5 + $0x80] sm:$0xff]   ;;  %p634_p4 = por %p633_p3, %p632_p2 }
  0x2d   :  { %531 = vmatprep.mubr.msk.bf16.mxu0 %vm661_vm0, %v660_v0  ;;  %498 = vmatpush3.bf16.msra.mxu1 %v546_v6 }
  0x2e   :  { %499 = vmatprep.subr.bf16.mxu1 %v660_v0  ;;  %516 = vmatpush3.bf16.msra.mxu0 %v553_v52  ;;  %p635_p5 = pnand %p634_p4, %p628_p1 }
  0x2f   :  { %517 = vmatprep.subr.bf16.mxu0 %v660_v0 }
  0x31   :  { %500 = vmatpush3.bf16.msra.mxu1 %v547_v7 }
  0x32   :  { %501 = vmatprep.subr.bf16.mxu1 %v660_v0  ;;  %518 = vmatpush3.bf16.msra.mxu0 %v554_v53 }
  0x33   :  { %519 = vmatprep.subr.bf16.mxu0 %v660_v0 }
  0x35   :  { %502 = vmatpush3.bf16.msra.mxu1 %v548_v8 }
  0x36   :  { %503 = vmatprep.subr.bf16.mxu1 %v660_v0  ;;  %520 = vmatpush3.bf16.msra.mxu0 %v555_v54 }
  0x37   :  { %521 = vmatprep.subr.bf16.mxu0 %v660_v0 }
  0x39   :  { %504 = vmatpush3.bf16.msra.mxu1 %v549_v9 }
  0x3a   :  { %505 = vmatprep.subr.bf16.mxu1 %v660_v0  ;;  %522 = vmatpush3.bf16.msra.mxu0 %v556_v55 }
  0x3b   :  { %523 = vmatprep.subr.bf16.mxu0 %v660_v0 }
  0x3d   :  { %506 = vmatpush3.bf16.msra.mxu1 %v550_v10 }
  0x3e   :  { %507 = vmatprep.subr.bf16.mxu1 %v660_v0  ;;  %524 = vmatpush3.bf16.msra.mxu0 %v557_v56  ;;  %v415_v56 = vld [vmem:[#allocation7 + $0x4] sm:$0x3] }
  0x3f   :  { %525 = vmatprep.subr.bf16.mxu0 %v660_v0 }
  0x41   :  { %508 = vmatpush3.bf16.msra.mxu1 %v551_v11 }
  0x42   :  { %509 = vmatprep.subr.bf16.mxu1 %v660_v0  ;;  %526 = vmatpush3.bf16.msra.mxu0 %v558_v57 }
  0x43   :  { %527 = vmatprep.subr.bf16.mxu0 %v660_v0 }
  0x45   :  { %510 = vmatpush3.bf16.msra.mxu1 %v552_v12 }
  0x46   :  { %528 = vmatpush3.bf16.msra.mxu0 %v559_v58 }
  0x47   :  { %529 = vmatprep.subr.bf16.mxu0 %v660_v0 }
  0x4a   :  { %530 = vmatpush3.bf16.msra.mxu0 %v560_v59 }
  0xec   :  { %v100_v13 = vpop.f32.mrf.mxu0 }
  0xed   :  { %v106_v14 = vrot.slane %v100_v13, 4  ;;  %v114_v15 = vmul.f32 %v100_v13, %v100_v13 }
  0xee   :  { %v493_v16 = vpop.f32.mrf.mxu0 }
  0xef   :  { %v107_v17 = vadd.f32 %v106_v14, %v100_v13  ;;  %v115_v18 = vrot.slane %v114_v15, 4 }
  0xf0   :  { %v103_v19 = vpop.f32.mrf.mxu0 }
  0xf1   :  { %v108_v20 = vrot.slane %v107_v17, 2  ;;  %v116_v21 = vadd.f32 %v115_v18, %v114_v15  ;;  %v270_v19 = vld [vmem:[#allocation7 + $0x2] sm:$0x3] }
  0xf2   :  { %v494_v22 = vpop.f32.mrf.mxu0 }
  0xf3   :  { %v109_v23 = vadd.f32 %v108_v20, %v107_v17  ;;  %v117_v24 = vrot.slane %v116_v21, 2 }
  0xf5   :  { %v110_v25 = vrot.slane %v109_v23, 1  ;;  %v118_v26 = vadd.f32 %v117_v24, %v116_v21 }
  0xf7   :  { %v111_v27 = vadd.f32 %v110_v25, %v109_v23  ;;  %v119_v28 = vrot.slane %v118_v26, 1 }
  0xf9   :  { %v113_v29 = vmul.f32 0.125, %v111_v27  ;;  %v120_v30 = vadd.f32 %v119_v28, %v118_v26 }
  0xfb   :  { %v121_v31 = vmul.f32 0.125, %v120_v30  ;;  %v122_v32 = vmul.f32 %v113_v29, %v113_v29 }
  0xfd   :  { %v123_v33 = vsub.f32 %v121_v31, %v122_v32 }
  0xff   :  { %v124_v34 = vmax.f32 %v123_v33, 0.0 }
 0x101   :  { %v126_v35 = vadd.f32 1e-05, %v124_v34 }
 0x103   :  { %561 = vrsqrt.f32 %v126_v35 }
 0x110   :  { %v562_v39 = vpop.eup %561 }
 0x111   :  { %v128_v40 = vmul.f32 %v562_v39, %v125_v38 }
 0x113   :  { %v129_v42 = vmul.f32 %v128_v40, %v113_v29  ;;  %v137_v43 = vrot.slane %v128_v40, %v705_v41 }
 0x115   :  { %v131_v44 = vrot.slane %v129_v42, 7  ;;  %v138_v47 = vmul.f32 %v137_v43, %v100_v13 }
 0x117   :  { %v133_v46 = vsub.f32 %v125_v38, %v131_v44 }
 0x119   :  { %v142_v48 = vrot.slane %v133_v46, %v708_v45 }
 0x11b   :  { %v143_v49 = vadd.f32 %v142_v48, %v138_v47 }
 0x11d   :  { %v144_v50 = vmax.f32 %v143_v49, 0.0 }
 0x11f   :  { %v162_v51 = vpack.c.bf16 %v144_v50, %v144_v50 }
 0x121   :  { %512 = vmatmul.mubr.bf16.vlgmr.msra.gmra.mxu1 %v162_v51 }
 0x1e1   :  { %v245_v60 = vpop.f32.mrf.mxu1 }
 0x1e2   :  { %v251_v61 = vrot.slane %v245_v60, 4  ;;  %v258_v62 = vmul.f32 %v245_v60, %v245_v60 }
 0x1e3   :  { %v513_v63 = vpop.f32.mrf.mxu1 }
 0x1e4   :  { %v252_v1 = vadd.f32 %v251_v61, %v245_v60  ;;  %v259_v2 = vrot.slane %v258_v62, 4 }
 0x1e5   :  { %v248_v3 = vpop.f32.mrf.mxu1 }
 0x1e6   :  { %v253_v4 = vrot.slane %v252_v1, 2  ;;  %v260_v5 = vadd.f32 %v259_v2, %v258_v62 }
 0x1e7   :  { %v514_v6 = vpop.f32.mrf.mxu1 }
 0x1e8   :  { %v254_v7 = vadd.f32 %v253_v4, %v252_v1  ;;  %v261_v8 = vrot.slane %v260_v5, 2 }
 0x1ea   :  { %v255_v9 = vrot.slane %v254_v7, 1  ;;  %v262_v10 = vadd.f32 %v261_v8, %v260_v5 }
 0x1ec   :  { %v256_v11 = vadd.f32 %v255_v9, %v254_v7  ;;  %v263_v12 = vrot.slane %v262_v10, 1 }
 0x1ee   :  { %v257_v13 = vmul.f32 0.125, %v256_v11  ;;  %v264_v0 = vadd.f32 %v263_v12, %v262_v10 }
 0x1f0   :  { %v265_v14 = vmul.f32 0.125, %v264_v0  ;;  %v266_v15 = vmul.f32 %v257_v13, %v257_v13 }
 0x1f2   :  { %v267_v16 = vsub.f32 %v265_v14, %v266_v15 }
 0x1f4   :  { %v268_v17 = vmax.f32 %v267_v16, 0.0 }
 0x1f6   :  { %v271_v18 = vadd.f32 1e-05, %v268_v17 }
 0x1f8   :  { %563 = vrsqrt.f32 %v271_v18 }
 0x205   :  { %v564_v20 = vpop.eup %563 }
 0x206   :  { %v273_v21 = vmul.f32 %v564_v20, %v270_v19 }
 0x208   :  { %v274_v22 = vmul.f32 %v273_v21, %v257_v13  ;;  %v282_v24 = vrot.slane %v273_v21, %v705_v41 }
 0x20a   :  { %v276_v23 = vrot.slane %v274_v22, 7  ;;  %v283_v26 = vmul.f32 %v282_v24, %v245_v60 }
 0x20c   :  { %v278_v25 = vsub.f32 %v270_v19, %v276_v23 }
 0x20e   :  { %v287_v27 = vrot.slane %v278_v25, %v708_v45 }
 0x210   :  { %v288_v28 = vadd.f32 %v287_v27, %v283_v26 }
 0x212   :  { %v289_v29 = vmax.f32 %v288_v28, 0.0 }
 0x214   :  { %v307_v30 = vpack.c.bf16 %v289_v29, %v289_v29 }
 0x216   :  { %532 = vmatmul.mubr.bf16.vlgmr.msra.gmra.mxu0 %v307_v30 }
 0x2d6   :  { %v390_v31 = vpop.f32.mrf.mxu0 }
 0x2d7   :  { %v396_v32 = vrot.slane %v390_v31, 4  ;;  %v403_v33 = vmul.f32 %v390_v31, %v390_v31 }
 0x2d8   :  { %v533_v34 = vpop.f32.mrf.mxu0 }
 0x2d9   :  { %v397_v35 = vadd.f32 %v396_v32, %v390_v31  ;;  %v404_v36 = vrot.slane %v403_v33, 4 }
 0x2da   :  { %v393_v37 = vpop.f32.mrf.mxu0 }
 0x2db   :  { %v398_v38 = vrot.slane %v397_v35, 2  ;;  %v405_v39 = vadd.f32 %v404_v36, %v403_v33 }
 0x2dc   :  { %v534_v40 = vpop.f32.mrf.mxu0 }
 0x2dd   :  { %v399_v42 = vadd.f32 %v398_v38, %v397_v35  ;;  %v406_v43 = vrot.slane %v405_v39, 2 }
 0x2df   :  { %v400_v44 = vrot.slane %v399_v42, 1  ;;  %v407_v46 = vadd.f32 %v406_v43, %v405_v39 }
 0x2e1   :  { %v401_v47 = vadd.f32 %v400_v44, %v399_v42  ;;  %v408_v48 = vrot.slane %v407_v46, 1 }
 0x2e3   :  { %v402_v49 = vmul.f32 0.125, %v401_v47  ;;  %v409_v50 = vadd.f32 %v408_v48, %v407_v46 }
 0x2e5   :  { %v410_v51 = vmul.f32 0.125, %v409_v50  ;;  %v411_v52 = vmul.f32 %v402_v49, %v402_v49 }
 0x2e7   :  { %v412_v53 = vsub.f32 %v410_v51, %v411_v52 }
 0x2e9   :  { %v413_v54 = vmax.f32 %v412_v53, 0.0 }
 0x2eb   :  { %v416_v55 = vadd.f32 1e-05, %v413_v54 }
 0x2ed   :  { %565 = vrsqrt.f32 %v416_v55 }
 0x2fa   :  { %v566_v57 = vpop.eup %565 }
 0x2fb   :  { %v418_v58 = vmul.f32 %v566_v57, %v415_v56 }
 0x2fd   :  { %v419_v59 = vmul.f32 %v418_v58, %v402_v49  ;;  %v427_v60 = vrot.slane %v418_v58, %v705_v41 }
 0x2ff   :  { %v421_v61 = vrot.slane %v419_v59, 7  ;;  %v428_v63 = vmul.f32 %v427_v60, %v390_v31 }
 0x301   :  { %v423_v62 = vsub.f32 %v415_v56, %v421_v61 }
 0x303   :  { %v432_v1 = vrot.slane %v423_v62, %v708_v45 }
 0x305   :  { %v433_v2 = vadd.f32 %v432_v1, %v428_v63 }
 0x307   :  { %435 = vst.msk [vmem:[#allocation8] sm:$0xff] %vm434_vm3, %v433_v2 }
 0x308   :  { %638 = shalt.err (!%p635_p5)
}
 0x309   :  { %445 = dma.vmem_to_hbm [thread:$0]  %s443_s2, 128, %s728_s3, [#allocation4]  }
 0x30a   :  { %651 = dma.done.wait [#allocation4], 128  }
 0x30b   :  { %652 = vsyncadd [#allocation4], 4294967168 }
 0x30c   :  { %449 = vsyncpa [#allocation3], 1 }
 0x30d   :  { %450 = vsyncpa [#allocation6], 1 }
 0x30e   :  { %451 = vsyncpa [#allocation4], 1 }

</bundles_post_ra>
